<compile_context>
chip_gen: v5e
topology: v5e:2x2
jax: 0.10.0
libtpu: 0.0.40
codegen_flags: <defaults>
</compile_context>

<pallas_src>
import functools
import math

import jax
import jax.numpy as jnp
from jax import lax
from jax.experimental import pallas as pl
from jax.experimental.pallas import tpu as pltpu

LANE = 128


def _round_up(v, m):
    return ((v + m - 1) // m) * m


def _pad2d(a, rows, cols):
    r, c = a.shape
    return jnp.pad(a, ((0, rows - r), (0, cols - c)))


# ----------------------------- kernel 1 --------------------------------------
def _norm_linear1_kernel(x_ref, w1_ref, b1_ref, z1_ref):
    """z1 = trunc(l2_normalize(x) @ W1) + b1 for one row tile."""
    x = x_ref[...].astype(jnp.float32)
    sumsq = jnp.sum(x * x, axis=1, keepdims=True)
    # F.normalize: x / max(||x||, 1e-12) == x * rsqrt(max(||x||^2, 1e-24)) (EUP rsqrt)
    xn = x * lax.rsqrt(jnp.maximum(sumsq, 1e-24))
    z = jnp.dot(xn, w1_ref[...], preferred_element_type=jnp.float32)
    # .long() truncates toward zero; float bias add promotes back to f32.
    z1_ref[...] = jnp.trunc(z) + b1_ref[...]


# ----------------------------- kernel 2 --------------------------------------
def _g_dropout_linear2_kernel(g_ref, z1_ref, rand_ref, w2_ref, b2_ref, z2_ref,
                              acc_ref, *, keep_prob):
    """acc += G[i,k] @ z1[k]; at last k: z2 = trunc(dropout(acc) @ W2) + b2."""
    @pl.when(pl.program_id(1) == 0)
    def _init():
        acc_ref[...] = jnp.zeros_like(acc_ref)

    acc_ref[...] += jnp.dot(g_ref[...], z1_ref[...].astype(g_ref.dtype),
                            preferred_element_type=jnp.float32)

    @pl.when(pl.program_id(1) == pl.num_programs(1) - 1)
    def _finalize():
        h = acc_ref[...]
        keep = rand_ref[...] < keep_prob                       # inverted dropout
        h = jnp.where(keep, h * (1.0 / keep_prob), 0.0)
        z = jnp.dot(h, w2_ref[...], preferred_element_type=jnp.float32)
        z2_ref[...] = jnp.trunc(z) + b2_ref[...]


# ----------------------------- kernel 3 --------------------------------------
def _g_matmul_kernel(g_ref, z2_ref, y_ref, acc_ref):
    """y = G @ z2, k-tiled with a resident f32 accumulator."""
    @pl.when(pl.program_id(1) == 0)
    def _init():
        acc_ref[...] = jnp.zeros_like(acc_ref)

    acc_ref[...] += jnp.dot(g_ref[...], z2_ref[...].astype(g_ref.dtype),
                            preferred_element_type=jnp.float32)

    @pl.when(pl.program_id(1) == pl.num_programs(1) - 1)
    def _finalize():
        y_ref[...] = acc_ref[...]


# ------------------------------ wrapper --------------------------------------
def hgcn2_forward(x, G, w1, b1, w2, b2, seed, *, dropout_p=0.5,
                  g_dtype=jnp.float32):
    assert 0.0 <= dropout_p < 1.0
    n, in_ch = x.shape
    n_hid = w1.shape[1]
    n_class = w2.shape[1]

    # Pad everything to 128-multiples (lane-dense MXU / unmasked stores).
    np_ = _round_up(max(n, LANE), LANE)
    fp = _round_up(in_ch, LANE)
    hp = _round_up(n_hid, LANE)
    cp = _round_up(n_class, LANE)

    # G tiles: rows (tm) x reduction cols (tk).  Kept modest so double-buffered
    # inputs fit comfortably under the default scoped-VMEM limit on v5e/v6e
    # (128 MiB physical) and v7x (64 MiB physical).
    tm = 256 if np_ % 256 == 0 else 128
    tk = 512 if np_ % 512 == 0 else (256 if np_ % 256 == 0 else 128)

    xp = _pad2d(x.astype(jnp.float32), np_, fp)
    gp = _pad2d(G.astype(jnp.float32), np_, np_).astype(g_dtype)
    w1p = _pad2d(w1.astype(jnp.float32), fp, hp)
    b1p = _pad2d(b1.reshape(1, -1).astype(jnp.float32), 1, hp)
    w2p = _pad2d(w2.astype(jnp.float32), hp, cp)
    b2p = _pad2d(b2.reshape(1, -1).astype(jnp.float32), 1, cp)

    keep_prob = 1.0 - float(dropout_p)
    # TODO(synk): dropout randomness is drawn host-side (jax.random) instead of the
    # in-kernel TPU PRNG (pltpu.prng_seed fails to lower under interpret/CPU); the
    # keep/scale is still fused into kernel 2.  Torch's RNG stream cannot be matched.
    rand = jax.random.uniform(jax.random.PRNGKey(seed), (np_, hp), jnp.float32)

    g_bytes = int(np_ * np_ * jnp.dtype(g_dtype).itemsize)

    # ---- stage 1: z1 = trunc(normalize(x) @ W1) + b1 -------------------------
    z1 = pl.pallas_call(
        _norm_linear1_kernel,
        out_shape=jax.ShapeDtypeStruct((np_, hp), jnp.float32),
        grid=(np_ // tm,),
        in_specs=[
            pl.BlockSpec((tm, fp), lambda i: (i, 0)),
            pl.BlockSpec((fp, hp), lambda i: (0, 0)),
            pl.BlockSpec((1, hp), lambda i: (0, 0)),
        ],
        out_specs=pl.BlockSpec((tm, hp), lambda i: (i, 0)),
        compiler_params=pltpu.CompilerParams(dimension_semantics=("parallel",)),
        cost_estimate=pl.CostEstimate(
            flops=2 * np_ * fp * hp + 4 * np_ * fp,
            transcendentals=np_,
            bytes_accessed=4 * (np_ * fp + fp * hp + np_ * hp)),
    )(xp, w1p, b1p)

    # ---- stage 2: z2 = trunc(dropout(G @ z1) @ W2) + b2 ----------------------
    kernel2 = functools.partial(_g_dropout_linear2_kernel, keep_prob=keep_prob)
    z2 = pl.pallas_call(
        kernel2,
        out_shape=jax.ShapeDtypeStruct((np_, cp), jnp.float32),
        grid=(np_ // tm, np_ // tk),
        in_specs=[
            pl.BlockSpec((tm, tk), lambda i, k: (i, k)),     # G tile
            pl.BlockSpec((tk, hp), lambda i, k: (k, 0)),     # z1 rows for this k
            pl.BlockSpec((tm, hp), lambda i, k: (i, 0)),     # dropout uniforms
            pl.BlockSpec((hp, cp), lambda i, k: (0, 0)),     # W2 (full)
            pl.BlockSpec((1, cp), lambda i, k: (0, 0)),      # b2 row
        ],
        out_specs=pl.BlockSpec((tm, cp), lambda i, k: (i, 0)),
        scratch_shapes=[pltpu.VMEM((tm, hp), jnp.float32)],
        compiler_params=pltpu.CompilerParams(
            dimension_semantics=("parallel", "arbitrary")),
        cost_estimate=pl.CostEstimate(
            flops=2 * np_ * np_ * hp + 2 * np_ * hp * cp,
            transcendentals=0,
            bytes_accessed=g_bytes + 4 * (2 * np_ * hp + np_ * cp + hp * cp)),
    )(gp, z1, rand, w2p, b2p)

    # ---- stage 3: y = G @ z2 --------------------------------------------------
    y = pl.pallas_call(
        _g_matmul_kernel,
        out_shape=jax.ShapeDtypeStruct((np_, cp), jnp.float32),
        grid=(np_ // tm, np_ // tk),
        in_specs=[
            pl.BlockSpec((tm, tk), lambda i, k: (i, k)),     # G tile
            pl.BlockSpec((tk, cp), lambda i, k: (k, 0)),     # z2 rows for this k
        ],
        out_specs=pl.BlockSpec((tm, cp), lambda i, k: (i, 0)),
        scratch_shapes=[pltpu.VMEM((tm, cp), jnp.float32)],
        compiler_params=pltpu.CompilerParams(
            dimension_semantics=("parallel", "arbitrary")),
        cost_estimate=pl.CostEstimate(
            flops=2 * np_ * np_ * cp,
            transcendentals=0,
            bytes_accessed=g_bytes + 4 * (2 * np_ * cp)),
    )(gp, z2)

    return y[:n, :n_class]


def init_hgcn2_params(key, in_ch, n_hid, n_class):
    """HGNN_conv.reset_parameters: uniform(-stdv, stdv), stdv = 1/sqrt(out_ft)."""
    k1, k2, k3, k4 = jax.random.split(key, 4)
    s1 = 1.0 / math.sqrt(n_hid)
    s2 = 1.0 / math.sqrt(n_class)
    w1 = jax.random.uniform(k1, (in_ch, n_hid), jnp.float32, -s1, s1)
    b1 = jax.random.uniform(k2, (n_hid,), jnp.float32, -s1, s1)
    w2 = jax.random.uniform(k3, (n_hid, n_class), jnp.float32, -s2, s2)
    b2 = jax.random.uniform(k4, (n_class,), jnp.float32, -s2, s2)
    return w1, b1, w2, b2


if __name__ == "__main__":
    # Small, deterministic problem: 16 nodes, 32 input features, 16 hidden, 8 classes.
    N, IN_CH, N_HID, N_CLASS = 16, 32, 16, 8

    key = jax.random.PRNGKey(0)
    kx, kg, kp = jax.random.split(key, 3)

    x = jax.random.normal(kx, (N, IN_CH), dtype=jnp.float32) * 4.0
    G = jax.random.normal(kg, (N, N), dtype=jnp.float32)
    w1, b1, w2, b2 = init_hgcn2_params(kp, IN_CH, N_HID, N_CLASS)

    out = hgcn2_forward(x, G, w1, b1, w2, b2, seed=42, dropout_p=0.5)
    out = jax.block_until_ready(out)

    assert out.shape == (N, N_CLASS) and out.dtype == jnp.float32
    assert bool(jnp.all(jnp.isfinite(out)))
    print("KERNEL_OK")
</pallas_src>

<mosaic_0001>
module attributes {stable_mosaic.version = 11 : i64} {
  func.func @_norm_linear1_kernel(%arg0: i32, %arg1: memref<128x128xf32, #tpu.memory_space<vmem>>, %arg2: memref<128x128xf32, #tpu.memory_space<vmem>>, %arg3: memref<1x128xf32, #tpu.memory_space<vmem>>, %arg4: memref<128x128xf32, #tpu.memory_space<vmem>>) attributes {dimension_semantics = [#tpu.dimension_semantics<parallel>], iteration_bounds = array<i64: 1>, scalar_prefetch = 0 : i64, scratch_operands = 0 : i64, tpu.core_type = #tpu.core_type<tc>, window_params = [{transform_indices = @transform_0, window_bounds = array<i64: 128, 128>}, {pipeline_mode = #tpu.pipeline_mode<synchronous>, transform_indices = @transform_1, window_bounds = array<i64: 128, 128>}, {pipeline_mode = #tpu.pipeline_mode<synchronous>, transform_indices = @transform_2, window_bounds = array<i64: 1, 128>}, {transform_indices = @transform_3, window_bounds = array<i64: 128, 128>}]} {
    %c0 = arith.constant 0 : index
    %c0_0 = arith.constant 0 : index
    %0 = vector.load %arg1[%c0, %c0_0] : memref<128x128xf32, #tpu.memory_space<vmem>>, vector<128x128xf32>
    %1 = arith.mulf %0, %0 : vector<128x128xf32>
    %cst = arith.constant dense<0.000000e+00> : vector<128xf32>
    %2 = vector.multi_reduction <add>, %1, %cst [1] : vector<128x128xf32> to vector<128xf32>
    %3 = vector.shape_cast %2 : vector<128xf32> to vector<128x1xf32>
    %cst_1 = arith.constant 1.000000e-24 : f32
    %4 = vector.broadcast %cst_1 : f32 to vector<128x1xf32>
    %5 = arith.maximumf %3, %4 : vector<128x1xf32>
    %6 = math.rsqrt %5 : vector<128x1xf32>
    %7 = vector.broadcast %6 : vector<128x1xf32> to vector<128x128xf32>
    %8 = arith.mulf %0, %7 : vector<128x128xf32>
    %c0_2 = arith.constant 0 : index
    %c0_3 = arith.constant 0 : index
    %9 = vector.load %arg2[%c0_2, %c0_3] : memref<128x128xf32, #tpu.memory_space<vmem>>, vector<128x128xf32>
    %cst_4 = arith.constant dense<0.000000e+00> : vector<128x128xf32>
    %10 = tpu.matmul %8, %9, %cst_4 {dimension_numbers = #tpu.dot_dimension_numbers<[1], [0], [0], [1], [0, 0, 1, 1], [], []>} : vector<128x128xf32>, vector<128x128xf32>, vector<128x128xf32> -> vector<128x128xf32>
    %cst_5 = arith.constant 0.000000e+00 : f32
    %11 = vector.broadcast %cst_5 : f32 to vector<128x128xf32>
    %12 = arith.cmpf olt, %10, %11 : vector<128x128xf32>
    %13 = math.ceil %10 : vector<128x128xf32>
    %14 = math.floor %10 : vector<128x128xf32>
    %15 = arith.select %12, %13, %14 : vector<128x128xi1>, vector<128x128xf32>
    %c0_6 = arith.constant 0 : index
    %c0_7 = arith.constant 0 : index
    %16 = vector.load %arg3[%c0_6, %c0_7] : memref<1x128xf32, #tpu.memory_space<vmem>>, vector<1x128xf32>
    %17 = vector.broadcast %16 : vector<1x128xf32> to vector<128x128xf32>
    %18 = arith.addf %15, %17 : vector<128x128xf32>
    %c0_8 = arith.constant 0 : index
    %c0_9 = arith.constant 0 : index
    %19 = vector.load %arg4[%c0_8, %c0_9] : memref<128x128xf32, #tpu.memory_space<vmem>>, vector<128x128xf32>
    tpu.vector_store %arg4[%c0_8, %c0_9], %18 {strides = array<i32>} : memref<128x128xf32, #tpu.memory_space<vmem>>, vector<128x128xf32>,
    return
  }
  func.func @transform_0(%arg0: i32) -> (i32, i32) {
    %c0_i32 = arith.constant 0 : i32
    %c0_i32_0 = arith.constant 0 : i32
    return %arg0, %c0_i32 : i32, i32
  }
  func.func @transform_1(%arg0: i32) -> (i32, i32) {
    %c0_i32 = arith.constant 0 : i32
    %c0_i32_0 = arith.constant 0 : i32
    %c0_i32_1 = arith.constant 0 : i32
    return %c0_i32, %c0_i32_0 : i32, i32
  }
  func.func @transform_2(%arg0: i32) -> (i32, i32) {
    %c0_i32 = arith.constant 0 : i32
    %c0_i32_0 = arith.constant 0 : i32
    %c0_i32_1 = arith.constant 0 : i32
    return %c0_i32, %c0_i32_0 : i32, i32
  }
  func.func @transform_3(%arg0: i32) -> (i32, i32) {
    %c0_i32 = arith.constant 0 : i32
    %c0_i32_0 = arith.constant 0 : i32
    return %arg0, %c0_i32 : i32, i32
  }
}

</mosaic_0001>

<bundles_post_ra>
// kernel: tpu_custom_call.1
= control target key start
LH: loop header
LB: loop body
LE: loop exit
PB: predicated region body
PF: predicated region fallthrough
CT: control target
= control target key end

     0   :  { %8 = vsyncpa [#allocation3], 0  ;;  %s1013_s0 = inlined_call_operand.hbm [shape: f32[128,128], index: 0, kind: input, shape index: {}]   ;;  %s1014_s1 = inlined_call_operand.hbm [shape: f32[128,128], index: 1, kind: input, shape index: {}]   ;;  %s1015_s2 = inlined_call_operand.vmem [shape: f32[1,128], index: 2, kind: input, shape index: {}]   ;;  %s1016_s3 = inlined_call_operand.hbm [shape: f32[128,128], index: 3, kind: output, shape index: {}]  }
   0x1   :  { %9 = vsyncpa [#allocation6], 0 }
   0x2   :  { %10 = vsyncpa [#allocation4], 0  ;;  %s15_s14 = sshll.u32 %s1013_s0, 4  ;;  %s668_s15 = smov [#allocation2]   ;;  %s16_s14 = int_to_ptr.hbm [resolvable:$true] %s15_s14 }
   0x3   :  { %s17_s16 = sshll.u32 %s668_s15, 4  ;;  %s28_s19 = sshll.u32 %s1014_s1, 4  ;;  %s18_s16 = int_to_ptr.vmem [resolvable:$true] %s17_s16  ;;  %s29_s19 = int_to_ptr.hbm [resolvable:$true] %s28_s19 }
   0x4   :  { %s669_s20 = smov 128   ;;  %s670_s21 = smov 8  }
   0x5   :  { %23 = dma.hbm_to_vmem [thread:$0]  %s16_s14, 2048, %s18_s16, [#allocation3], %s669_s20, %s669_s20, %s670_s21  }
   0x6   :  { %s671_s22 = smov [#allocation5]  }
   0x7   :  { %s30_s23 = sshll.u32 %s671_s22, 4  ;;  %s31_s23 = int_to_ptr.vmem [resolvable:$true] %s30_s23 }
   0x8   :  { %36 = dma.hbm_to_vmem [thread:$0]  %s29_s19, 2048, %s31_s23, [#allocation6], %s669_s20, %s669_s20, %s670_s21  }
   0x9   :  { %662 = dma.done.wait [#allocation3], 2048  }
   0xa   :  { %663 = vsyncadd [#allocation3], 4294965248 }
   0xb   :  { %664 = dma.done.wait [#allocation6], 2048  }
   0xc   :  { %665 = vsyncadd [#allocation6], 4294965248  ;;  %v705_v0 = vld [vmem:[#allocation2 + $0x48] sm:$0xff]  ;;  %v707_v1 = vld [vmem:[#allocation2 + $0x40] sm:$0xff]  ;;  %s490_s27 = sshll.u32 %s1016_s3, 4  ;;  %s491_s27 = int_to_ptr.hbm [resolvable:$true] %s490_s27 }
   0xd   :  { %v709_v2 = vld [vmem:[#allocation2] sm:$0xff]  ;;  %v72_v3 = vmul.f32 %v705_v0, %v705_v0  ;;  %v71_v4 = vmul.f32 %v707_v1, %v707_v1  ;;  %v717_v6 = vld [vmem:[#allocation2 + $0x68] sm:$0xff]  ;;  %v318_v12 = vld [vmem:[#allocation5 + $0x78] sm:$0xff] }
   0xe   :  { %v63_v5 = vmul.f32 %v709_v2, %v709_v2  ;;  %v719_v7 = vld [vmem:[#allocation2 + $0x60] sm:$0xff]  ;;  %v76_v9 = vmul.f32 %v717_v6, %v717_v6  ;;  %v317_v13 = vld [vmem:[#allocation5 + $0x70] sm:$0xff]  ;;  %v731_v15 = vld [vmem:[#allocation2 + $0x8] sm:$0xff]  ;;  %319 = vmatpush.msra.mxu0 %v318_v12  ;;  %505 = vmatpush.msra.mxu2 %v318_v12 }
   0xf   :  { %97 = vadd.xlane.f32.xlu2 %v72_v3  ;;  %95 = vadd.xlane.f32.xlu0 %v71_v4  ;;  %v721_v8 = vld [vmem:[#allocation2 + $0x20] sm:$0xff]  ;;  %v75_v10 = vmul.f32 %v719_v7, %v719_v7  ;;  %v729_v14 = vld [vmem:[#allocation2 + $0x50] sm:$0xff]  ;;  %v733_v16 = vld [vmem:[#allocation2 + $0x28] sm:$0xff]  ;;  %v64_v19 = vmul.f32 %v731_v15, %v731_v15 }
  0x10   :  { %79 = vadd.xlane.f32.xlu1 %v63_v5  ;;  %v67_v11 = vmul.f32 %v721_v8, %v721_v8  ;;  %v316_v17 = vld [vmem:[#allocation5 + $0x68] sm:$0xff]  ;;  %504 = vmatpush.msra.mxu1 %v318_v12  ;;  %v73_v18 = vmul.f32 %v729_v14, %v729_v14  ;;  %v315_v20 = vld [vmem:[#allocation5 + $0x60] sm:$0xff]  ;;  %v68_v21 = vmul.f32 %v733_v16, %v733_v16  ;;  %v314_v22 = vld [vmem:[#allocation5 + $0x58] sm:$0xff] }
  0x11   :  { %320 = vmatpush.msra.mxu0 %v317_v13  ;;  %506 = vmatpush.msra.mxu3 %v318_v12  ;;  %v741_v23 = vld [vmem:[#allocation2 + $0x30] sm:$0xff]  ;;  %v753_v29 = vld [vmem:[#allocation2 + $0x18] sm:$0xff]  ;;  %v312_v38 = vld [vmem:[#allocation5 + $0x48] sm:$0xff] }
  0x12   :  { %508 = vmatpush.msra.mxu2 %v317_v13  ;;  %507 = vmatpush.msra.mxu1 %v317_v13  ;;  %v743_v24 = vld [vmem:[#allocation2 + $0x70] sm:$0xff]  ;;  %v69_v26 = vmul.f32 %v741_v23, %v741_v23  ;;  %v755_v30 = vld [vmem:[#allocation2 + $0x58] sm:$0xff]  ;;  %v66_v32 = vmul.f32 %v753_v29, %v753_v29  ;;  %v311_v39 = vld [vmem:[#allocation5 + $0x40] sm:$0xff] }
  0x13   :  { %321 = vmatpush.msra.mxu0 %v316_v17  ;;  %509 = vmatpush.msra.mxu3 %v317_v13  ;;  %v745_v25 = vld [vmem:[#allocation2 + $0x10] sm:$0xff]  ;;  %v77_v27 = vmul.f32 %v743_v24, %v743_v24  ;;  %v757_v31 = vld [vmem:[#allocation2 + $0x78] sm:$0xff]  ;;  %v74_v33 = vmul.f32 %v755_v30, %v755_v30  ;;  %v308_v42 = vld [vmem:[#allocation5 + $0x28] sm:$0xff] }
  0x14   :  { %511 = vmatpush.msra.mxu2 %v316_v17  ;;  %510 = vmatpush.msra.mxu1 %v316_v17  ;;  %v65_v28 = vmul.f32 %v745_v25, %v745_v25  ;;  %v78_v34 = vmul.f32 %v757_v31, %v757_v31  ;;  %v765_v35 = vld [vmem:[#allocation2 + $0x38] sm:$0xff]  ;;  %v313_v37 = vld [vmem:[#allocation5 + $0x50] sm:$0xff]  ;;  %v307_v43 = vld [vmem:[#allocation5 + $0x20] sm:$0xff] }
  0x15   :  { %322 = vmatpush.msra.mxu0 %v315_v20  ;;  %512 = vmatpush.msra.mxu3 %v316_v17  ;;  %v70_v36 = vmul.f32 %v765_v35, %v765_v35  ;;  %v310_v40 = vld [vmem:[#allocation5 + $0x38] sm:$0xff]  ;;  %v309_v41 = vld [vmem:[#allocation5 + $0x30] sm:$0xff]  ;;  %v304_v46 = vld [vmem:[#allocation5 + $0x8] sm:$0xff] }
  0x16   :  { %514 = vmatpush.msra.mxu2 %v315_v20  ;;  %513 = vmatpush.msra.mxu1 %v315_v20  ;;  %v306_v44 = vld [vmem:[#allocation5 + $0x18] sm:$0xff]  ;;  %v305_v45 = vld [vmem:[#allocation5 + $0x10] sm:$0xff]  ;;  %v303_v47 = vld [vmem:[#allocation5] sm:$0xff] }
  0x17   :  { %105 = vadd.xlane.f32.xlu2 %v76_v9  ;;  %103 = vadd.xlane.f32.xlu0 %v75_v10 }
  0x18   :  { %87 = vadd.xlane.f32.xlu1 %v67_v11  ;;  %323 = vmatpush.msra.mxu0 %v314_v22 }
  0x19   :  { %517 = vmatpush.msra.mxu2 %v314_v22  ;;  %515 = vmatpush.msra.mxu3 %v315_v20 }
  0x1a   :  { %516 = vmatpush.msra.mxu1 %v314_v22  ;;  %324 = vmatpush.msra.mxu0 %v313_v37 }
  0x1b   :  { %518 = vmatpush.msra.mxu3 %v314_v22  ;;  %520 = vmatpush.msra.mxu2 %v313_v37 }
  0x1c   :  { %519 = vmatpush.msra.mxu1 %v313_v37  ;;  %325 = vmatpush.msra.mxu0 %v312_v38 }
  0x1d   :  { %521 = vmatpush.msra.mxu3 %v313_v37  ;;  %523 = vmatpush.msra.mxu2 %v312_v38 }
  0x1e   :  { %522 = vmatpush.msra.mxu1 %v312_v38  ;;  %326 = vmatpush.msra.mxu0 %v311_v39 }
  0x1f   :  { %99 = vadd.xlane.f32.xlu2 %v73_v18  ;;  %81 = vadd.xlane.f32.xlu0 %v64_v19 }
  0x20   :  { %89 = vadd.xlane.f32.xlu1 %v68_v21  ;;  %524 = vmatpush.msra.mxu3 %v312_v38 }
  0x21   :  { %526 = vmatpush.msra.mxu2 %v311_v39  ;;  %525 = vmatpush.msra.mxu1 %v311_v39 }
  0x22   :  { %527 = vmatpush.msra.mxu3 %v311_v39  ;;  %327 = vmatpush.msra.mxu0 %v310_v40 }
  0x23   :  { %529 = vmatpush.msra.mxu2 %v310_v40  ;;  %528 = vmatpush.msra.mxu1 %v310_v40 }
  0x24   :  { %530 = vmatpush.msra.mxu3 %v310_v40  ;;  %328 = vmatpush.msra.mxu0 %v309_v41 }
  0x25   :  { %532 = vmatpush.msra.mxu2 %v309_v41  ;;  %531 = vmatpush.msra.mxu1 %v309_v41 }
  0x26   :  { %533 = vmatpush.msra.mxu3 %v309_v41  ;;  %329 = vmatpush.msra.mxu0 %v308_v42 }
  0x27   :  { %91 = vadd.xlane.f32.xlu2 %v69_v26  ;;  %107 = vadd.xlane.f32.xlu0 %v77_v27 }
  0x28   :  { %83 = vadd.xlane.f32.xlu1 %v65_v28  ;;  %535 = vmatpush.msra.mxu2 %v308_v42 }
  0x29   :  { %534 = vmatpush.msra.mxu1 %v308_v42  ;;  %536 = vmatpush.msra.mxu3 %v308_v42 }
  0x2a   :  { %330 = vmatpush.msra.mxu0 %v307_v43  ;;  %538 = vmatpush.msra.mxu2 %v307_v43 }
  0x2b   :  { %537 = vmatpush.msra.mxu1 %v307_v43  ;;  %539 = vmatpush.msra.mxu3 %v307_v43 }
  0x2c   :  { %331 = vmatpush.msra.mxu0 %v306_v44  ;;  %541 = vmatpush.msra.mxu2 %v306_v44 }
  0x2d   :  { %540 = vmatpush.msra.mxu1 %v306_v44  ;;  %542 = vmatpush.msra.mxu3 %v306_v44 }
  0x2e   :  { %332 = vmatpush.msra.mxu0 %v305_v45  ;;  %544 = vmatpush.msra.mxu2 %v305_v45 }
  0x2f   :  { %85 = vadd.xlane.f32.xlu2 %v66_v32  ;;  %101 = vadd.xlane.f32.xlu0 %v74_v33 }
  0x30   :  { %109 = vadd.xlane.f32.xlu1 %v78_v34  ;;  %543 = vmatpush.msra.mxu1 %v305_v45 }
  0x31   :  { %545 = vmatpush.msra.mxu3 %v305_v45  ;;  %333 = vmatpush.msra.mxu0 %v304_v46 }
  0x32   :  { %547 = vmatpush.msra.mxu2 %v304_v46  ;;  %546 = vmatpush.msra.mxu1 %v304_v46 }
  0x33   :  { %548 = vmatpush.msra.mxu3 %v304_v46  ;;  %334 = vmatpush.msra.mxu0 %v303_v47 }
  0x34   :  { %550 = vmatpush.msra.mxu2 %v303_v47  ;;  %549 = vmatpush.msra.mxu1 %v303_v47 }
  0x35   :  { %551 = vmatpush.msra.mxu3 %v303_v47 }
  0x37   :  { %93 = vadd.xlane.f32.xlu0 %v70_v36 }
  0x82   :  { %v98_v48 = vpop.xlane.xlu2 %97  ;;  %v96_v49 = vpop.xlane.xlu0 %95 }
  0x83   :  { %v769_v50 = vmax.f32 %v98_v48, 1e-24  ;;  %v119_v51 = vmax.f32 %v96_v49, 1e-24  ;;  %v80_v52 = vpop.xlane.xlu1 %79 }
  0x84   :  { %v111_v53 = vmax.f32 %v80_v52, 1e-24 }
  0x85   :  { %558 = vrsqrt.f32 %v769_v50  ;;  %vm223_vm0 = vweird.f32 %v769_v50  ;;  %vm213_vm1 = vweird.f32 %v119_v51 }
  0x86   :  { %560 = vrsqrt.f32 %v119_v51  ;;  %vm133_vm2 = vweird.f32 %v111_v53 }
  0x87   :  { %562 = vrsqrt.f32 %v111_v53 }
  0x8a   :  { %v106_v54 = vpop.xlane.xlu2 %105  ;;  %v104_v55 = vpop.xlane.xlu0 %103 }
  0x8b   :  { %v772_v56 = vpop.eup %558  ;;  %v774_v57 = vmax.f32 %v106_v54, 1e-24  ;;  %v776_v58 = vmax.f32 %v104_v55, 1e-24  ;;  %v88_v59 = vpop.xlane.xlu1 %87 }
  0x8c   :  { %v561_v60 = vpop.eup %560  ;;  %v218_v61 = vmul.f32 %v772_v56, %v769_v50  ;;  %v780_v62 = vmax.f32 %v88_v59, 1e-24  ;;  %vm224_vm5 = vweird.f32 %v772_v56 }
  0x8d   :  { %v563_v63 = vpop.eup %562  ;;  %v208_v3 = vmul.f32 %v561_v60, %v119_v51  ;;  %564 = vrsqrt.f32 %v774_v57  ;;  %vm214_vm4 = vweird.f32 %v561_v60  ;;  %vm253_vm7 = vweird.f32 %v776_v58  ;;  %vm824_vm11 = vmor %vm223_vm0, %vm224_vm5 }
  0x8e   :  { %v219_v4 = vmul.f32 %v772_v56, %v218_v61  ;;  %v128_v5 = vmul.f32 %v563_v63, %v111_v53  ;;  %566 = vrsqrt.f32 %v776_v58  ;;  %vm134_vm3 = vweird.f32 %v563_v63  ;;  %vm215_vm9 = vmor %vm213_vm1, %vm214_vm4 }
  0x8f   :  { %v209_v9 = vmul.f32 %v561_v60, %v208_v3  ;;  %568 = vrsqrt.f32 %v780_v62  ;;  %vm135_vm6 = vmor %vm133_vm2, %vm134_vm3  ;;  %vm173_vm8 = vweird.f32 %v780_v62  ;;  %vm263_vm12 = vweird.f32 %v774_v57 }
  0x90   :  { %v220_v10 = vmul.f32 0.5, %v219_v4  ;;  %v129_v11 = vmul.f32 %v563_v63, %v128_v5 }
  0x91   :  { %v210_v12 = vmul.f32 0.5, %v209_v9 }
  0x92   :  { %v221_v13 = vsub.f32 1.5, %v220_v10  ;;  %v130_v17 = vmul.f32 0.5, %v129_v11  ;;  %v100_v18 = vpop.xlane.xlu2 %99  ;;  %v82_v19 = vpop.xlane.xlu0 %81 }
  0x93   :  { %v787_v20 = vpop.eup %564  ;;  %v211_v21 = vsub.f32 1.5, %v210_v12  ;;  %v789_v22 = vmax.f32 %v100_v18, 1e-24  ;;  %v791_v26 = vmax.f32 %v82_v19, 1e-24  ;;  %v90_v27 = vpop.xlane.xlu1 %89 }
  0x94   :  { %v793_v28 = vpop.eup %566  ;;  %v131_v32 = vsub.f32 1.5, %v130_v17  ;;  %v258_v33 = vmul.f32 %v787_v20, %v774_v57  ;;  %v797_v34 = vmax.f32 %v90_v27, 1e-24  ;;  %v222_v40 = vmul.f32 %v772_v56, %v221_v13 }
  0x95   :  { %v799_v36 = vpop.eup %568  ;;  %v248_v37 = vmul.f32 %v793_v28, %v776_v58  ;;  %570 = vrsqrt.f32 %v789_v22  ;;  %v212_v43 = vmul.f32 %v561_v60, %v211_v21  ;;  %vm233_vm10 = vweird.f32 %v789_v22 }
  0x96   :  { %v259_v38 = vmul.f32 %v787_v20, %v258_v33  ;;  %v168_v39 = vmul.f32 %v799_v36, %v780_v62  ;;  %572 = vrsqrt.f32 %v791_v26  ;;  %v132_v42 = vmul.f32 %v563_v63, %v131_v32 }
  0x97   :  { %v249_v41 = vmul.f32 %v793_v28, %v248_v37  ;;  %574 = vrsqrt.f32 %v797_v34  ;;  %v216_v48 = vsel %vm215_vm9, %v561_v60, %v212_v43  ;;  %vm174_vm13 = vweird.f32 %v799_v36 }
  0x98   :  { %v169_v44 = vmul.f32 %v799_v36, %v168_v39  ;;  %v260_v45 = vmul.f32 0.5, %v259_v38  ;;  %v136_v47 = vsel %vm135_vm6, %v563_v63, %v132_v42  ;;  %v295_v53 = vmul.f32 %v216_v48, %v707_v1  ;;  %vm175_vm0 = vmor %vm173_vm8, %vm174_vm13 }
  0x99   :  { %v250_v46 = vmul.f32 0.5, %v249_v41  ;;  %v287_v52 = vmul.f32 %v136_v47, %v709_v2  ;;  %v226_v1 = vsel %vm824_vm11, %v772_v56, %v222_v40  ;;  %vm143_vm14 = vweird.f32 %v791_v26 }
  0x9a   :  { %v170_v49 = vmul.f32 0.5, %v169_v44  ;;  %v92_v54 = vpop.xlane.xlu2 %91  ;;  %v108_v55 = vpop.xlane.xlu0 %107  ;;  %359 = vmatmul.f32.vlgmr.msra.gmra.mxu2 %v295_v53  ;;  %v261_v10 = vsub.f32 1.5, %v260_v45  ;;  %vm254_vm15 = vweird.f32 %v793_v28  ;;  %v296_v13 = vmul.f32 %v226_v1, %v705_v0 }
  0x9b   :  { %v828_v59 = vpop.eup %570  ;;  %v251_v60 = vsub.f32 1.5, %v250_v46  ;;  %v830_v61 = vmax.f32 %v92_v54, 1e-24  ;;  %v832_v63 = vmax.f32 %v108_v55, 1e-24  ;;  %v84_v2 = vpop.xlane.xlu1 %83  ;;  %335 = vmatmul.f32.vlgmr.msra.gmra.mxu0 %v287_v52  ;;  %vm255_vm1 = vmor %vm253_vm7, %vm254_vm15  ;;  %vm264_vm4 = vweird.f32 %v787_v20 }
  0x9c   :  { %v837_v3 = vpop.eup %572  ;;  %v171_v50 = vsub.f32 1.5, %v170_v49  ;;  %v228_v4 = vmul.f32 %v828_v59, %v789_v22  ;;  %v842_v5 = vmax.f32 %v84_v2, 1e-24  ;;  %vm234_vm3 = vweird.f32 %v828_v59 }
  0x9d   :  { %v845_v9 = vpop.eup %574  ;;  %v138_v56 = vmul.f32 %v837_v3, %v791_v26  ;;  %576 = vrsqrt.f32 %v830_v61  ;;  %v252_v19 = vmul.f32 %v793_v28, %v251_v60  ;;  %vm144_vm2 = vweird.f32 %v837_v3  ;;  %vm898_vm7 = vmor %vm233_vm10, %vm234_vm3 }
  0x9e   :  { %v229_v11 = vmul.f32 %v828_v59, %v228_v4  ;;  %v178_v12 = vmul.f32 %v845_v9, %v797_v34  ;;  %578 = vrsqrt.f32 %v832_v63  ;;  %v172_v18 = vmul.f32 %v799_v36, %v171_v50  ;;  %vm911_vm9 = vmor %vm143_vm14, %vm144_vm2 }
  0x9f   :  { %v139_v17 = vmul.f32 %v837_v3, %v138_v56  ;;  %580 = vrsqrt.f32 %v842_v5  ;;  %v256_v33 = vsel %vm255_vm1, %v793_v28, %v252_v19  ;;  %v262_v62 = vmul.f32 %v787_v20, %v261_v10  ;;  %vm923_vm10 = vmor %vm263_vm12, %vm264_vm4 }
  0xa0   :  { %v230_v21 = vmul.f32 0.5, %v229_v11  ;;  %v179_v27 = vmul.f32 %v845_v9, %v178_v12  ;;  %v176_v32 = vsel %vm175_vm0, %v799_v36, %v172_v18  ;;  %v299_v40 = vmul.f32 %v256_v33, %v719_v7 }
  0xa1   :  { %v140_v0 = vmul.f32 0.5, %v139_v17  ;;  %v291_v39 = vmul.f32 %v176_v32, %v721_v8  ;;  %vm183_vm5 = vweird.f32 %v797_v34  ;;  %vm184_vm6 = vweird.f32 %v845_v9 }
  0xa2   :  { %v231_v37 = vsub.f32 1.5, %v230_v21  ;;  %v180_v38 = vmul.f32 0.5, %v179_v27  ;;  %v86_v41 = vpop.xlane.xlu2 %85  ;;  %v102_v58 = vpop.xlane.xlu0 %101  ;;  %362 = vmatmul.f32.gmra.mxu2 %v296_v13  ;;  %371 = vmatmul.f32.vlgmr.msra.gmra.mxu3 %v299_v40  ;;  %vm193_vm8 = vweird.f32 %v830_v61  ;;  %vm185_vm11 = vmor %vm183_vm5, %vm184_vm6  ;;  %v266_v4 = vsel %vm923_vm10, %v787_v20, %v262_v62 }
  0xa3   :  { %v873_v42 = vpop.eup %576  ;;  %v141_v43 = vsub.f32 1.5, %v140_v0  ;;  %v875_v44 = vmax.f32 %v86_v41, 1e-24  ;;  %v877_v45 = vmax.f32 %v102_v58, 1e-24  ;;  %v110_v36 = vpop.xlane.xlu1 %109  ;;  %347 = vmatmul.f32.vlgmr.msra.gmra.mxu1 %v291_v39  ;;  %v300_v20 = vmul.f32 %v266_v4, %v717_v6 }
  0xa4   :  { %v880_v28 = vpop.eup %578  ;;  %v181_v46 = vsub.f32 1.5, %v180_v38  ;;  %v188_v8 = vmul.f32 %v873_v42, %v830_v61  ;;  %v884_v7 = vmax.f32 %v110_v36, 1e-24  ;;  %v232_v47 = vmul.f32 %v828_v59, %v231_v37 }
  0xa5   :  { %v887_v48 = vpop.eup %580  ;;  %v268_v49 = vmul.f32 %v880_v28, %v832_v63  ;;  %582 = vrsqrt.f32 %v875_v44  ;;  %v142_v51 = vmul.f32 %v837_v3, %v141_v43  ;;  %vm194_vm13 = vweird.f32 %v873_v42 }
  0xa6   :  { %v189_v53 = vmul.f32 %v873_v42, %v188_v8  ;;  %v148_v54 = vmul.f32 %v887_v48, %v842_v5  ;;  %584 = vrsqrt.f32 %v877_v45  ;;  %v182_v60 = vmul.f32 %v845_v9, %v181_v46  ;;  %vm195_vm15 = vmor %vm193_vm8, %vm194_vm13 }
  0xa7   :  { %v269_v22 = vmul.f32 %v880_v28, %v268_v49  ;;  %586 = vrsqrt.f32 %v884_v7  ;;  %v236_v50 = vsel %vm898_vm7, %v828_v59, %v232_v47  ;;  %v146_v57 = vsel %vm911_vm9, %v837_v3, %v142_v51 }
  0xa8   :  { %v190_v26 = vmul.f32 0.5, %v189_v53  ;;  %v149_v1 = vmul.f32 %v887_v48, %v148_v54  ;;  %v186_v56 = vsel %vm185_vm11, %v845_v9, %v182_v60  ;;  %v297_v11 = vmul.f32 %v236_v50, %v729_v14 }
  0xa9   :  { %v270_v10 = vmul.f32 0.5, %v269_v22  ;;  %v288_v13 = vmul.f32 %v146_v57, %v731_v15  ;;  %v292_v17 = vmul.f32 %v186_v56, %v733_v16  ;;  %vm154_vm12 = vweird.f32 %v887_v48 }
  0xaa   :  { %v191_v12 = vsub.f32 1.5, %v190_v26  ;;  %v150_v34 = vmul.f32 0.5, %v149_v1  ;;  %v94_v59 = vpop.xlane.xlu0 %93  ;;  %vm153_vm14 = vweird.f32 %v842_v5  ;;  %365 = vmatmul.f32.gmra.mxu2 %v297_v11  ;;  %374 = vmatmul.f32.gmra.mxu3 %v300_v20  ;;  %vm273_vm0 = vweird.f32 %v832_v63 }
  0xab   :  { %v943_v18 = vpop.eup %582  ;;  %v271_v19 = vsub.f32 1.5, %v270_v10  ;;  %v946_v21 = vmax.f32 %v94_v59, 1e-24  ;;  %338 = vmatmul.f32.gmra.mxu0 %v288_v13  ;;  %350 = vmatmul.f32.gmra.mxu1 %v292_v17  ;;  %vm155_vm1 = vmor %vm153_vm14, %vm154_vm12  ;;  %vm274_vm2 = vweird.f32 %v880_v28  ;;  %vm163_vm4 = vweird.f32 %v875_v44 }
  0xac   :  { %v585_v3 = vpop.eup %584  ;;  %v151_v9 = vsub.f32 1.5, %v150_v34  ;;  %v158_v14 = vmul.f32 %v943_v18, %v875_v44  ;;  %v192_v15 = vmul.f32 %v873_v42, %v191_v12  ;;  %vm275_vm3 = vmor %vm273_vm0, %vm274_vm2  ;;  %vm164_vm5 = vweird.f32 %v943_v18 }
  0xad   :  { %v587_v16 = vpop.eup %586  ;;  %v238_v6 = vmul.f32 %v585_v3, %v877_v45  ;;  %588 = vrsqrt.f32 %v946_v21  ;;  %v272_v27 = vmul.f32 %v880_v28, %v271_v19  ;;  %vm244_vm6 = vweird.f32 %v585_v3  ;;  %vm165_vm9 = vmor %vm163_vm4, %vm164_vm5 }
  0xae   :  { %v159_v0 = vmul.f32 %v943_v18, %v158_v14  ;;  %v278_v32 = vmul.f32 %v587_v16, %v884_v7  ;;  %v152_v33 = vmul.f32 %v887_v48, %v151_v9  ;;  %v196_v62 = vsel %vm195_vm15, %v873_v42, %v192_v15 }
  0xaf   :  { %v239_v5 = vmul.f32 %v585_v3, %v238_v6  ;;  %v293_v39 = vmul.f32 %v196_v62, %v741_v23  ;;  %v276_v63 = vsel %vm275_vm3, %v880_v28, %v272_v27  ;;  %vm284_vm7 = vweird.f32 %v587_v16 }
  0xb0   :  { %v160_v61 = vmul.f32 0.5, %v159_v0  ;;  %v279_v37 = vmul.f32 %v587_v16, %v278_v32  ;;  %v156_v38 = vsel %vm155_vm1, %v887_v48, %v152_v33  ;;  %v301_v43 = vmul.f32 %v276_v63, %v743_v24 }
  0xb1   :  { %v240_v40 = vmul.f32 0.5, %v239_v5  ;;  %v289_v41 = vmul.f32 %v156_v38, %v745_v25  ;;  %vm243_vm8 = vweird.f32 %v877_v45  ;;  %vm283_vm10 = vweird.f32 %v884_v7 }
  0xb2   :  { %v161_v58 = vsub.f32 1.5, %v160_v61  ;;  %v280_v42 = vmul.f32 0.5, %v279_v37  ;;  %377 = vmatmul.f32.gmra.mxu3 %v301_v43  ;;  %vm245_vm11 = vmor %vm243_vm8, %vm244_vm6  ;;  %vm203_vm14 = vweird.f32 %v946_v21 }
  0xb3   :  { %v589_v36 = vpop.eup %588  ;;  %v241_v46 = vsub.f32 1.5, %v240_v40  ;;  %341 = vmatmul.f32.gmra.mxu0 %v289_v41  ;;  %353 = vmatmul.f32.gmra.mxu1 %v293_v39  ;;  %vm285_vm12 = vmor %vm283_vm10, %vm284_vm7 }
  0xb4   :  { %v281_v8 = vsub.f32 1.5, %v280_v42  ;;  %v198_v23 = vmul.f32 %v589_v36, %v946_v21  ;;  %v162_v47 = vmul.f32 %v943_v18, %v161_v58  ;;  %vm204_vm13 = vweird.f32 %v589_v36 }
  0xb5   :  { %v242_v24 = vmul.f32 %v585_v3, %v241_v46  ;;  %vm205_vm15 = vmor %vm203_vm14, %vm204_vm13 }
  0xb6   :  { %v199_v25 = vmul.f32 %v589_v36, %v198_v23  ;;  %v166_v28 = vsel %vm165_vm9, %v943_v18, %v162_v47  ;;  %v282_v48 = vmul.f32 %v587_v16, %v281_v8 }
  0xb7   :  { %v246_v49 = vsel %vm245_vm11, %v585_v3, %v242_v24  ;;  %v290_v53 = vmul.f32 %v166_v28, %v753_v29  ;;  %v989_v29 = vld [vmem:[%s1015_s2] ss:$0 sm:$0xff]  ;;  %s672_s2 = smov [#allocation7]  }
  0xb8   :  { %v200_v52 = vmul.f32 0.5, %v199_v25  ;;  %v298_v54 = vmul.f32 %v246_v49, %v755_v30  ;;  %v286_v45 = vsel %vm285_vm12, %v587_v16, %v282_v48  ;;  %s488_s24 = sshll.u32 %s672_s2, 4  ;;  %s489_s24 = int_to_ptr.vmem [resolvable:$true] %s488_s24 }
  0xb9   :  { %v302_v55 = vmul.f32 %v286_v45, %v757_v31 }
  0xba   :  { %v201_v44 = vsub.f32 1.5, %v200_v52  ;;  %368 = vmatmul.f32.gmra.mxu2 %v298_v54 }
  0xbb   :  { %344 = vmatmul.f32.gmra.mxu0 %v290_v53  ;;  %380 = vmatmul.f32.gmra.mxu3 %v302_v55 }
  0xbc   :  { %v202_v7 = vmul.f32 %v589_v36, %v201_v44 }
  0xbe   :  { %v206_v22 = vsel %vm205_vm15, %v589_v36, %v202_v7 }
  0xbf   :  { %v294_v51 = vmul.f32 %v206_v22, %v765_v35 }
  0xc1   :  { %356 = vmatmul.f32.gmra.mxu1 %v294_v51 }
 0x118   :  { %v336_v60 = vpop.f32.mrf.mxu0 }
 0x119   :  { %vm384_vm0 = vcmp.lt.f32.partialorder %v336_v60, 0.0  ;;  %v400_v30 = vceil.f32 %v336_v60  ;;  %v416_v31 = vfloor.f32 %v336_v60 }
 0x11b   :  { %v432_v2 = vsel %vm384_vm0, %v400_v30, %v416_v31 }
 0x11c   :  { %v452_v26 = vadd.f32 %v989_v29, %v432_v2 }
 0x11d   :  { %v360_v1 = vpop.f32.mrf.mxu2 }
 0x11e   :  { %468 = vst [vmem:[#allocation7] sm:$0xff] %v452_v26  ;;  %vm392_vm1 = vcmp.lt.f32.partialorder %v360_v1, 0.0  ;;  %v408_v50 = vceil.f32 %v360_v1  ;;  %v424_v4 = vfloor.f32 %v360_v1 }
 0x120   :  { %v348_v10 = vpop.f32.mrf.mxu1  ;;  %v440_v35 = vsel %vm392_vm1, %v408_v50, %v424_v4 }
 0x121   :  { %vm388_vm2 = vcmp.lt.f32.partialorder %v348_v10, 0.0  ;;  %v404_v57 = vceil.f32 %v348_v10  ;;  %v420_v56 = vfloor.f32 %v348_v10  ;;  %v460_v11 = vadd.f32 %v989_v29, %v440_v35 }
 0x123   :  { %v436_v12 = vsel %vm388_vm2, %v404_v57, %v420_v56  ;;  %476 = vst [vmem:[#allocation7 + $0x40] sm:$0xff] %v460_v11 }
 0x124   :  { %v456_v34 = vadd.f32 %v989_v29, %v436_v12 }
 0x125   :  { %v363_v13 = vpop.f32.mrf.mxu2  ;;  %v372_v18 = vpop.f32.mrf.mxu3 }
 0x126   :  { %472 = vst [vmem:[#allocation7 + $0x20] sm:$0xff] %v456_v34  ;;  %vm393_vm3 = vcmp.lt.f32.partialorder %v363_v13, 0.0  ;;  %v409_v17 = vceil.f32 %v363_v13  ;;  %v425_v59 = vfloor.f32 %v363_v13  ;;  %vm396_vm4 = vcmp.lt.f32.partialorder %v372_v18, 0.0 }
 0x127   :  { %v412_v19 = vceil.f32 %v372_v18  ;;  %v428_v20 = vfloor.f32 %v372_v18 }
 0x128   :  { %v339_v21 = vpop.f32.mrf.mxu0  ;;  %v351_v3 = vpop.f32.mrf.mxu1  ;;  %v441_v9 = vsel %vm393_vm3, %v409_v17, %v425_v59 }
 0x129   :  { %vm385_vm5 = vcmp.lt.f32.partialorder %v339_v21, 0.0  ;;  %v401_v14 = vceil.f32 %v339_v21  ;;  %v417_v15 = vfloor.f32 %v339_v21  ;;  %v461_v16 = vadd.f32 %v989_v29, %v441_v9 }
 0x12a   :  { %v444_v6 = vsel %vm396_vm4, %v412_v19, %v428_v20  ;;  %vm389_vm6 = vcmp.lt.f32.partialorder %v351_v3, 0.0  ;;  %v405_v27 = vceil.f32 %v351_v3  ;;  %v421_v33 = vfloor.f32 %v351_v3 }
 0x12b   :  { %v464_v0 = vadd.f32 %v989_v29, %v444_v6  ;;  %v433_v32 = vsel %vm385_vm5, %v401_v14, %v417_v15  ;;  %477 = vst [vmem:[#allocation7 + $0x48] sm:$0xff] %v461_v16 }
 0x12c   :  { %v453_v62 = vadd.f32 %v989_v29, %v433_v32  ;;  %v437_v5 = vsel %vm389_vm6, %v405_v27, %v421_v33 }
 0x12d   :  { %480 = vst [vmem:[#allocation7 + $0x60] sm:$0xff] %v464_v0  ;;  %v457_v61 = vadd.f32 %v989_v29, %v437_v5  ;;  %v366_v37 = vpop.f32.mrf.mxu2  ;;  %v375_v38 = vpop.f32.mrf.mxu3 }
 0x12e   :  { %469 = vst [vmem:[#allocation7 + $0x8] sm:$0xff] %v453_v62  ;;  %vm394_vm7 = vcmp.lt.f32.partialorder %v366_v37, 0.0  ;;  %v410_v39 = vceil.f32 %v366_v37  ;;  %v426_v40 = vfloor.f32 %v366_v37  ;;  %vm397_vm8 = vcmp.lt.f32.partialorder %v375_v38, 0.0 }
 0x12f   :  { %473 = vst [vmem:[#allocation7 + $0x28] sm:$0xff] %v457_v61  ;;  %v413_v58 = vceil.f32 %v375_v38  ;;  %v429_v42 = vfloor.f32 %v375_v38 }
 0x130   :  { %v342_v41 = vpop.f32.mrf.mxu0  ;;  %v354_v63 = vpop.f32.mrf.mxu1  ;;  %v442_v36 = vsel %vm394_vm7, %v410_v39, %v426_v40 }
 0x131   :  { %vm386_vm9 = vcmp.lt.f32.partialorder %v342_v41, 0.0  ;;  %v402_v43 = vceil.f32 %v342_v41  ;;  %v418_v46 = vfloor.f32 %v342_v41  ;;  %vm390_vm10 = vcmp.lt.f32.partialorder %v354_v63, 0.0 }
 0x132   :  { %v406_v8 = vceil.f32 %v354_v63  ;;  %v462_v23 = vadd.f32 %v989_v29, %v442_v36  ;;  %v445_v47 = vsel %vm397_vm8, %v413_v58, %v429_v42  ;;  %v422_v24 = vfloor.f32 %v354_v63 }
 0x133   :  { %v465_v25 = vadd.f32 %v989_v29, %v445_v47  ;;  %v434_v28 = vsel %vm386_vm9, %v402_v43, %v418_v46 }
 0x134   :  { %478 = vst [vmem:[#allocation7 + $0x50] sm:$0xff] %v462_v23  ;;  %v454_v48 = vadd.f32 %v989_v29, %v434_v28  ;;  %v438_v49 = vsel %vm390_vm10, %v406_v8, %v422_v24 }
 0x135   :  { %481 = vst [vmem:[#allocation7 + $0x68] sm:$0xff] %v465_v25  ;;  %v458_v52 = vadd.f32 %v989_v29, %v438_v49  ;;  %v378_v53 = vpop.f32.mrf.mxu3 }
 0x136   :  { %470 = vst [vmem:[#allocation7 + $0x10] sm:$0xff] %v454_v48  ;;  %vm398_vm11 = vcmp.lt.f32.partialorder %v378_v53, 0.0  ;;  %v414_v54 = vceil.f32 %v378_v53  ;;  %v430_v45 = vfloor.f32 %v378_v53 }
 0x137   :  { %474 = vst [vmem:[#allocation7 + $0x30] sm:$0xff] %v458_v52 }
 0x138   :  { %v345_v55 = vpop.f32.mrf.mxu0  ;;  %v446_v22 = vsel %vm398_vm11, %v414_v54, %v430_v45 }
 0x139   :  { %vm387_vm12 = vcmp.lt.f32.partialorder %v345_v55, 0.0  ;;  %v403_v44 = vceil.f32 %v345_v55  ;;  %v419_v7 = vfloor.f32 %v345_v55  ;;  %v466_v51 = vadd.f32 %v989_v29, %v446_v22 }
 0x13b   :  { %v435_v60 = vsel %vm387_vm12, %v403_v44, %v419_v7  ;;  %482 = vst [vmem:[#allocation7 + $0x70] sm:$0xff] %v466_v51 }
 0x13c   :  { %v455_v30 = vadd.f32 %v989_v29, %v435_v60 }
 0x13d   :  { %v369_v31 = vpop.f32.mrf.mxu2 }
 0x13e   :  { %vm395_vm13 = vcmp.lt.f32.partialorder %v369_v31, 0.0  ;;  %v411_v2 = vceil.f32 %v369_v31  ;;  %v427_v26 = vfloor.f32 %v369_v31  ;;  %v357_v1 = vpop.f32.mrf.mxu1  ;;  %471 = vst [vmem:[#allocation7 + $0x18] sm:$0xff] %v455_v30  ;;  %v381_v35 = vpop.f32.mrf.mxu3 }
 0x13f   :  { %vm391_vm14 = vcmp.lt.f32.partialorder %v357_v1, 0.0  ;;  %v407_v50 = vceil.f32 %v357_v1  ;;  %v423_v4 = vfloor.f32 %v357_v1  ;;  %vm399_vm15 = vcmp.lt.f32.partialorder %v381_v35, 0.0 }
 0x140   :  { %v443_v10 = vsel %vm395_vm13, %v411_v2, %v427_v26  ;;  %v415_v56 = vceil.f32 %v381_v35  ;;  %v431_v11 = vfloor.f32 %v381_v35 }
 0x141   :  { %v463_v57 = vadd.f32 %v989_v29, %v443_v10  ;;  %v439_v12 = vsel %vm391_vm14, %v407_v50, %v423_v4 }
 0x142   :  { %v447_v34 = vsel %vm399_vm15, %v415_v56, %v431_v11  ;;  %v459_v13 = vadd.f32 %v989_v29, %v439_v12 }
 0x143   :  { %479 = vst [vmem:[#allocation7 + $0x58] sm:$0xff] %v463_v57  ;;  %v467_v17 = vadd.f32 %v989_v29, %v447_v34 }
 0x144   :  { %475 = vst [vmem:[#allocation7 + $0x38] sm:$0xff] %v459_v13 }
 0x145   :  { %483 = vst [vmem:[#allocation7 + $0x78] sm:$0xff] %v467_v17 }
 0x146   :  { %496 = dma.vmem_to_hbm [thread:$0]  %s489_s24, 2048, %s491_s27, [#allocation4], %s669_s20, %s669_s20, %s670_s21  }
 0x147   :  { %666 = dma.done.wait [#allocation4], 2048  }
 0x148   :  { %667 = vsyncadd [#allocation4], 4294965248 }
 0x149   :  { %501 = vsyncpa [#allocation3], 1 }
 0x14a   :  { %502 = vsyncpa [#allocation6], 1 }
 0x14b   :  { %503 = vsyncpa [#allocation4], 1 }

</bundles_post_ra>
